<compile_context>
chip_gen: v6e
topology: v6e:2x2x1
jax: 0.10.0
libtpu: 0.0.40
codegen_flags: <defaults>
</compile_context>

<pallas_src>
import math

import jax
import jax.numpy as jnp
import numpy as np
from jax.experimental import pallas as pl
from jax.experimental.pallas import tpu as pltpu

# ---------------------------------------------------------------------------
# Scaled-down kanachan constants (synthetic, shapes consistent with the module).
# ---------------------------------------------------------------------------
MAX_NUM_ACTION_CANDIDATES = 8      # M   (kanachan: 32)
NUM_TYPES_OF_ACTIONS = 16          # candidate ids >= this are padding (kanachan: 219)
NUM_TYPES_OF_SPARSE_FEATURES = 32
NUM_SPARSE = 8
NUM_NUMERIC = 2
NUM_TYPES_OF_PROGRESSION = 24
NUM_PROGRESSION = 6
ENCODER_WIDTH = NUM_SPARSE + NUM_NUMERIC + NUM_PROGRESSION + MAX_NUM_ACTION_CANDIDATES

DIMENSION = 32                     # d_model
DIM_FEEDFORWARD = 64
NUM_LAYERS = 2                     # each MLP head: Linear(D,F) -> ReLU -> Linear(F,1)
NUM_QR_INTERVALS = 4               # number of quantile heads
ACTIVATION = "relu"                # dropout is eval-mode identity

NUM_HEADS = 1 + NUM_QR_INTERVALS                 # value head + advantage heads
PACKED_F = NUM_HEADS * DIM_FEEDFORWARD           # 320 fused hidden rows
W1_ROWS = 8                                      # second-layer rows padded to 8 sublanes

TB_DEFAULT = 16                    # batch rows per block -> lanes = TB*M = 128


# ---------------------------------------------------------------------------
# Pallas kernel: fused ValueDecoder + quantile advantage heads + dueling combine
# + masking + mean over quantile intervals.  One grid step per TB-row batch block.
# ---------------------------------------------------------------------------
def theta_q_kernel(cand_ref, xT_ref, w0_ref, w1_ref, bias_ref, q_ref):
    M = MAX_NUM_ACTION_CANDIDATES
    L = q_ref.shape[2]                                    # TB * M lanes (multiple of 128)

    x = xT_ref[0]                                         # (D, L) bf16
    cand = cand_ref[0]                                    # (1, L) int32
    mask = cand < NUM_TYPES_OF_ACTIONS

    b0 = bias_ref[0:PACKED_F, :]                          # (5F, 1) f32
    b1 = bias_ref[PACKED_F:PACKED_F + W1_ROWS, :]         # (8, 1)  f32

    # Fused first layer of all 5 MLP heads: single bf16 MXU matmul, f32 accumulate.
    h = jnp.dot(w0_ref[...], x, preferred_element_type=jnp.float32) + b0     # (5F, L)
    h = jnp.maximum(h, 0.0)                                                   # ReLU (f32 VPU)

    # Fused second layer: block-structured (8, 5F) matrix.
    #   row 0 -> per-candidate value-head output
    #   row 1 -> mean over the 4 advantage heads (1/N folded into the weights)
    #   rows 2..7 -> zero padding
    out = jnp.dot(w1_ref[...], h, preferred_element_type=jnp.float32) + b1    # (8, L)

    v = jnp.where(mask, out[0:1, :], -jnp.inf)            # (1, L) masked value-head outputs
    adv_mean = out[1:2, :]                                # (1, L) mean advantage

    # ValueDecoder pooling: masked max within each aligned group of M=8 lanes
    # (one batch row per group) via an XOR butterfly on the XLU; after log2(M)
    # steps every lane holds its group's max (i.e. value broadcast per row).
    lane = jax.lax.broadcasted_iota(jnp.int32, v.shape, 1)
    s = 1
    while s < M:                                          # static python loop (3 steps)
        up = pltpu.roll(v, L - s, axis=1)                 # lane l <- v[l + s]
        dn = pltpu.roll(v, s, axis=1)                     # lane l <- v[l - s]
        v = jnp.maximum(v, jnp.where((lane & s) == 0, up, dn))
        s *= 2
    value = v                                             # (1, L) per-row state value

    # theta[:, :, i] = where(valid, value + adv_i, -inf);  q = mean_i theta
    #                = where(valid, value + mean_i(adv_i), -inf)
    q_ref[0] = jnp.where(mask, value + adv_mean, -jnp.inf)


# ---------------------------------------------------------------------------
# Parameter packing: 10 tiny per-head weight/bias tensors -> 3 fused blocks.
# ---------------------------------------------------------------------------
def pack_decoder_params(p):
    F, N = DIM_FEEDFORWARD, NUM_QR_INTERVALS
    # layer 0: rows [0:F]=value head, rows [(i+1)F:(i+2)F]=advantage head i
    w0 = jnp.concatenate([p["wv0T"]] + [p["w0T"][i] for i in range(N)], axis=0)   # (5F, D)
    b0 = jnp.concatenate([p["bv0c"]] + [p["b0c"][i] for i in range(N)], axis=0)   # (5F, 1)

    # layer 1: block-structured; row 0 = value head, row 1 = mean of advantage heads.
    w1 = jnp.zeros((W1_ROWS, PACKED_F), jnp.float32)
    w1 = w1.at[0, 0:F].set(p["wv1T"][0])
    for i in range(N):
        w1 = w1.at[1, (i + 1) * F:(i + 2) * F].set(p["w1T"][i, 0] / N)
    b1 = jnp.zeros((W1_ROWS, 1), jnp.float32)
    b1 = b1.at[0, 0].set(p["bv1c"][0, 0])
    b1 = b1.at[1, 0].set(jnp.mean(p["b1c"][:, 0, 0]))

    return {
        "w0_packed": w0.astype(jnp.bfloat16),                 # (5F, D)   bf16 MXU operand
        "w1_packed": w1,                                      # (8, 5F)   f32 (tiny matmul)
        "bias_packed": jnp.concatenate([b0, b1], axis=0),     # (5F+8, 1) f32
    }


# ---------------------------------------------------------------------------
# Wrapper: encoder glue (plain JAX) + pallas_call for the fused decoder hot path.
# ---------------------------------------------------------------------------
def encoder_glue(params, sparse, numeric, progression, candidates):
    # TODO(synk): kanachan's Encoder (transformer stack) source was not provided;
    # encode is built from deterministic embedding / linear lookups only.
    e_sparse = params["emb_sparse"][sparse]                                        # (B, NS, D)
    e_num = numeric[:, :, None] * params["w_num"][None] + params["b_num"][None]    # (B, NN, D)
    e_prog = params["emb_prog"][progression]                                       # (B, NP, D)
    e_cand = params["emb_cand"][candidates]                                        # (B, M, D)
    return jnp.concatenate([e_sparse, e_num, e_prog, e_cand], axis=1)              # (B, EW, D)


def q_forward(params, sparse, numeric, progression, candidates, *, tb=TB_DEFAULT):
    B = candidates.shape[0]
    M, D = MAX_NUM_ACTION_CANDIDATES, DIMENSION

    encode = encoder_glue(params, sparse, numeric, progression, candidates)
    assert encode.shape == (B, ENCODER_WIDTH, D)
    x_tail = encode[:, -M:, :].astype(jnp.float32)                 # (B, M, D)
    cand = candidates.astype(jnp.int32)                            # (B, M)

    # Pad batch to a multiple of tb with all-invalid rows (sliced off afterwards).
    pad = (-B) % tb
    if pad:
        x_tail = jnp.concatenate(
            [x_tail, jnp.zeros((pad, M, D), x_tail.dtype)], axis=0)
        cand = jnp.concatenate(
            [cand, jnp.full((pad, M), NUM_TYPES_OF_ACTIONS, jnp.int32)], axis=0)
    Bp = B + pad
    nb = Bp // tb
    L = tb * M                                                     # lanes per block (>=128)

    # Lane-dense packing: tb batch rows and the M candidates share the lane axis.
    xT = (x_tail.reshape(nb, tb, M, D)
                .transpose(0, 3, 1, 2)
                .reshape(nb, D, L)
                .astype(jnp.bfloat16))                             # (nb, D, L) bf16
    cand3 = cand.reshape(nb, 1, L)                                 # (nb, 1, L) int32

    packed = pack_decoder_params(params)

    q3 = pl.pallas_call(
        theta_q_kernel,
        out_shape=jax.ShapeDtypeStruct((nb, 1, L), jnp.float32),
        grid=(nb,),
        in_specs=[
            pl.BlockSpec((1, 1, L), lambda b: (b, 0, 0)),                # candidates
            pl.BlockSpec((1, D, L), lambda b: (b, 0, 0)),                # encode tail (packed)
            pl.BlockSpec((PACKED_F, D), lambda b: (0, 0)),               # fused layer-0 weights
            pl.BlockSpec((W1_ROWS, PACKED_F), lambda b: (0, 0)),         # fused layer-1 weights
            pl.BlockSpec((PACKED_F + W1_ROWS, 1), lambda b: (0, 0)),     # fused biases
        ],
        out_specs=pl.BlockSpec((1, 1, L), lambda b: (b, 0, 0)),          # lane-dense output
        compiler_params=pltpu.CompilerParams(dimension_semantics=("parallel",)),
    )(cand3, xT, packed["w0_packed"], packed["w1_packed"], packed["bias_packed"])

    return q3.reshape(Bp, M)[:B]                                   # (B, M)


# ---------------------------------------------------------------------------
# Deterministic parameter init (shapes from the module's __init__).
# ---------------------------------------------------------------------------
def init_params(key):
    ks = jax.random.split(key, 13)

    def lin(k, fan_in, shape):
        bound = 1.0 / math.sqrt(fan_in)
        return jax.random.uniform(k, shape, jnp.float32, -bound, bound)

    p = {}
    p["emb_sparse"] = 0.1 * jax.random.normal(ks[0], (NUM_TYPES_OF_SPARSE_FEATURES, DIMENSION), jnp.float32)
    p["w_num"] = 0.1 * jax.random.normal(ks[1], (NUM_NUMERIC, DIMENSION), jnp.float32)
    p["b_num"] = 0.1 * jax.random.normal(ks[2], (NUM_NUMERIC, DIMENSION), jnp.float32)
    p["emb_prog"] = 0.1 * jax.random.normal(ks[3], (NUM_TYPES_OF_PROGRESSION, DIMENSION), jnp.float32)
    p["emb_cand"] = 0.1 * jax.random.normal(ks[4], (NUM_TYPES_OF_ACTIONS + 2, DIMENSION), jnp.float32)
    # ValueDecoder MLP (Linear(D,F) -> ReLU -> Linear(F,1)), stored pre-transposed.
    # TODO(synk): kanachan's ValueDecoder source was not provided; modeled as the same MLP
    # head applied per candidate token followed by a masked max over candidates.
    p["wv0T"] = lin(ks[5], DIMENSION, (DIM_FEEDFORWARD, DIMENSION))
    p["bv0c"] = lin(ks[6], DIMENSION, (DIM_FEEDFORWARD, 1))
    p["wv1T"] = lin(ks[7], DIM_FEEDFORWARD, (1, DIM_FEEDFORWARD))
    p["bv1c"] = lin(ks[8], DIM_FEEDFORWARD, (1, 1))
    # num_qr_intervals advantage heads, same structure, stacked along axis 0.
    p["w0T"] = lin(ks[9], DIMENSION, (NUM_QR_INTERVALS, DIM_FEEDFORWARD, DIMENSION))
    p["b0c"] = lin(ks[10], DIMENSION, (NUM_QR_INTERVALS, DIM_FEEDFORWARD, 1))
    p["w1T"] = lin(ks[11], DIM_FEEDFORWARD, (NUM_QR_INTERVALS, 1, DIM_FEEDFORWARD))
    p["b1c"] = lin(ks[12], DIM_FEEDFORWARD, (NUM_QR_INTERVALS, 1, 1))
    return p


# ---------------------------------------------------------------------------
# Pure-JAX f32 reference mirroring the PyTorch forward (for verification).
# ---------------------------------------------------------------------------
def q_reference(params, sparse, numeric, progression, candidates):
    encode = encoder_glue(params, sparse, numeric, progression, candidates)
    x = encode[:, -MAX_NUM_ACTION_CANDIDATES:, :]                  # (B, M, D)
    mask = candidates < NUM_TYPES_OF_ACTIONS

    def mlp(x, w0T, b0c, w1T, b1c):
        h = jnp.maximum(jnp.einsum("bmd,fd->bmf", x, w0T) + b0c[:, 0][None, None, :], 0.0)
        return jnp.einsum("bmf,of->bmo", h, w1T)[:, :, 0] + b1c[0, 0]

    v = mlp(x, params["wv0T"], params["bv0c"], params["wv1T"], params["bv1c"])
    v = jnp.where(mask, v, -jnp.inf)
    value = jnp.max(v, axis=1, keepdims=True)                      # (B, 1)

    thetas = []
    for i in range(NUM_QR_INTERVALS):
        adv = mlp(x, params["w0T"][i], params["b0c"][i], params["w1T"][i], params["b1c"][i])
        thetas.append(jnp.where(mask, value + adv, -jnp.inf))
    theta = jnp.stack(thetas, axis=2)                              # (B, M, NQR)
    return jnp.sum(theta * (1.0 / NUM_QR_INTERVALS), axis=2)       # (B, M)


if __name__ == "__main__":
    key = jax.random.PRNGKey(0)
    k_params, k_sp, k_num, k_prog, k_cand = jax.random.split(key, 5)
    B = 32   # -> 2 lane-dense blocks of TB=16 rows (128 lanes each)

    params = init_params(k_params)
    sparse = jax.random.randint(k_sp, (B, NUM_SPARSE), 0, NUM_TYPES_OF_SPARSE_FEATURES)
    numeric = jax.random.uniform(k_num, (B, NUM_NUMERIC), jnp.float32)
    progression = jax.random.randint(k_prog, (B, NUM_PROGRESSION), 0, NUM_TYPES_OF_PROGRESSION)
    candidates = jax.random.randint(
        k_cand, (B, MAX_NUM_ACTION_CANDIDATES), 0, NUM_TYPES_OF_ACTIONS + 2)
    candidates = candidates.at[:, 0].set(0)   # guarantee >=1 valid candidate per row

    q = jax.block_until_ready(q_forward(params, sparse, numeric, progression, candidates))
    assert q.shape == (B, MAX_NUM_ACTION_CANDIDATES)

    q_ref = q_reference(params, sparse, numeric, progression, candidates)
    finite = np.asarray(jnp.isfinite(q_ref))
    # bf16 activations/weights in the kernel path -> compare with bf16-appropriate tolerance.
    np.testing.assert_allclose(np.asarray(q)[finite], np.asarray(q_ref)[finite],
                               rtol=2e-2, atol=2e-2)
    assert bool(jnp.all(jnp.isneginf(q) == jnp.isneginf(q_ref)))

    print("KERNEL_OK")
</pallas_src>

<mosaic_0001>
module attributes {stable_mosaic.version = 11 : i64} {
  func.func @theta_q_kernel(%arg0: i32, %arg1: memref<1x1x128xi32, #tpu.memory_space<vmem>>, %arg2: memref<1x32x128xbf16, #tpu.memory_space<vmem>>, %arg3: memref<320x32xbf16, #tpu.memory_space<vmem>>, %arg4: memref<8x320xf32, #tpu.memory_space<vmem>>, %arg5: memref<328x1xf32, #tpu.memory_space<vmem>>, %arg6: memref<1x1x128xf32, #tpu.memory_space<vmem>>) attributes {dimension_semantics = [#tpu.dimension_semantics<parallel>], iteration_bounds = array<i64: 2>, scalar_prefetch = 0 : i64, scratch_operands = 0 : i64, tpu.core_type = #tpu.core_type<tc>, window_params = [{transform_indices = @transform_0, window_bounds = array<i64: 1, 1, 128>}, {transform_indices = @transform_1, window_bounds = array<i64: 1, 32, 128>}, {pipeline_mode = #tpu.pipeline_mode<synchronous>, transform_indices = @transform_2, window_bounds = array<i64: 320, 32>}, {pipeline_mode = #tpu.pipeline_mode<synchronous>, transform_indices = @transform_3, window_bounds = array<i64: 8, 320>}, {pipeline_mode = #tpu.pipeline_mode<synchronous>, transform_indices = @transform_4, window_bounds = array<i64: 328, 1>}, {transform_indices = @transform_5, window_bounds = array<i64: 1, 1, 128>}]} {
    %c0 = arith.constant 0 : index
    %c0_0 = arith.constant 0 : index
    %c0_1 = arith.constant 0 : index
    %0 = vector.load %arg2[%c0, %c0_0, %c0_1] : memref<1x32x128xbf16, #tpu.memory_space<vmem>>, vector<1x32x128xbf16>
    %1 = vector.shape_cast %0 : vector<1x32x128xbf16> to vector<32x128xbf16>
    %c0_2 = arith.constant 0 : index
    %c0_3 = arith.constant 0 : index
    %c0_4 = arith.constant 0 : index
    %2 = vector.load %arg1[%c0_2, %c0_3, %c0_4] : memref<1x1x128xi32, #tpu.memory_space<vmem>>, vector<1x1x128xi32>
    %3 = vector.shape_cast %2 : vector<1x1x128xi32> to vector<1x128xi32>
    %c16_i32 = arith.constant 16 : i32
    %4 = vector.broadcast %c16_i32 : i32 to vector<1x128xi32>
    %5 = arith.cmpi slt, %3, %4 : vector<1x128xi32>
    %c0_5 = arith.constant 0 : index
    %c0_6 = arith.constant 0 : index
    %6 = vector.load %arg5[%c0_5, %c0_6] : memref<328x1xf32, #tpu.memory_space<vmem>>, vector<320x1xf32>
    %c320 = arith.constant 320 : index
    %c0_7 = arith.constant 0 : index
    %7 = vector.load %arg5[%c320, %c0_7] : memref<328x1xf32, #tpu.memory_space<vmem>>, vector<8x1xf32>
    %c0_8 = arith.constant 0 : index
    %c0_9 = arith.constant 0 : index
    %8 = vector.load %arg3[%c0_8, %c0_9] : memref<320x32xbf16, #tpu.memory_space<vmem>>, vector<320x32xbf16>
    %cst = arith.constant dense<0.000000e+00> : vector<320x128xf32>
    %9 = tpu.matmul %8, %1, %cst {dimension_numbers = #tpu.dot_dimension_numbers<[1], [0], [0], [1], [0, 0, 1, 1], [], []>} : vector<320x32xbf16>, vector<32x128xbf16>, vector<320x128xf32> -> vector<320x128xf32>
    %10 = vector.broadcast %6 : vector<320x1xf32> to vector<320x128xf32>
    %11 = arith.addf %9, %10 : vector<320x128xf32>
    %cst_10 = arith.constant 0.000000e+00 : f32
    %12 = vector.broadcast %cst_10 : f32 to vector<320x128xf32>
    %13 = arith.maximumf %11, %12 : vector<320x128xf32>
    %c0_11 = arith.constant 0 : index
    %c0_12 = arith.constant 0 : index
    %14 = vector.load %arg4[%c0_11, %c0_12] : memref<8x320xf32, #tpu.memory_space<vmem>>, vector<8x320xf32>
    %cst_13 = arith.constant dense<0.000000e+00> : vector<8x128xf32>
    %15 = tpu.matmul %14, %13, %cst_13 {dimension_numbers = #tpu.dot_dimension_numbers<[1], [0], [0], [1], [0, 0, 1, 1], [], []>} : vector<8x320xf32>, vector<320x128xf32>, vector<8x128xf32> -> vector<8x128xf32>
    %16 = vector.broadcast %7 : vector<8x1xf32> to vector<8x128xf32>
    %17 = arith.addf %15, %16 : vector<8x128xf32>
    %18 = vector.extract_strided_slice %17 {offsets = [0, 0], sizes = [1, 128], strides = [1, 1]} : vector<8x128xf32> to vector<1x128xf32>
    %cst_14 = arith.constant 0xFF800000 : f32
    %19 = vector.broadcast %cst_14 : f32 to vector<1x128xf32>
    %20 = arith.select %5, %18, %19 : vector<1x128xi1>, vector<1x128xf32>
    %21 = vector.extract_strided_slice %17 {offsets = [1, 0], sizes = [1, 128], strides = [1, 1]} : vector<8x128xf32> to vector<1x128xf32>
    %22 = tpu.iota {dimensions = array<i32: 1>} : vector<1x128xi32>
    %c127_i32 = arith.constant 127 : i32
    %23 = tpu.dynamic_rotate %20 by %c127_i32 dim 1 : vector<1x128xf32>, i32 -> vector<1x128xf32>
    %c1_i32 = arith.constant 1 : i32
    %24 = tpu.dynamic_rotate %20 by %c1_i32 dim 1 : vector<1x128xf32>, i32 -> vector<1x128xf32>
    %c1_i32_15 = arith.constant 1 : i32
    %25 = vector.broadcast %c1_i32_15 : i32 to vector<1x128xi32>
    %26 = arith.andi %22, %25 : vector<1x128xi32>
    %c0_i32 = arith.constant 0 : i32
    %27 = vector.broadcast %c0_i32 : i32 to vector<1x128xi32>
    %28 = arith.cmpi eq, %26, %27 : vector<1x128xi32>
    %29 = arith.select %28, %23, %24 : vector<1x128xi1>, vector<1x128xf32>
    %30 = arith.maximumf %20, %29 : vector<1x128xf32>
    %c126_i32 = arith.constant 126 : i32
    %31 = tpu.dynamic_rotate %30 by %c126_i32 dim 1 : vector<1x128xf32>, i32 -> vector<1x128xf32>
    %c2_i32 = arith.constant 2 : i32
    %32 = tpu.dynamic_rotate %30 by %c2_i32 dim 1 : vector<1x128xf32>, i32 -> vector<1x128xf32>
    %c2_i32_16 = arith.constant 2 : i32
    %33 = vector.broadcast %c2_i32_16 : i32 to vector<1x128xi32>
    %34 = arith.andi %22, %33 : vector<1x128xi32>
    %c0_i32_17 = arith.constant 0 : i32
    %35 = vector.broadcast %c0_i32_17 : i32 to vector<1x128xi32>
    %36 = arith.cmpi eq, %34, %35 : vector<1x128xi32>
    %37 = arith.select %36, %31, %32 : vector<1x128xi1>, vector<1x128xf32>
    %38 = arith.maximumf %30, %37 : vector<1x128xf32>
    %c124_i32 = arith.constant 124 : i32
    %39 = tpu.dynamic_rotate %38 by %c124_i32 dim 1 : vector<1x128xf32>, i32 -> vector<1x128xf32>
    %c4_i32 = arith.constant 4 : i32
    %40 = tpu.dynamic_rotate %38 by %c4_i32 dim 1 : vector<1x128xf32>, i32 -> vector<1x128xf32>
    %c4_i32_18 = arith.constant 4 : i32
    %41 = vector.broadcast %c4_i32_18 : i32 to vector<1x128xi32>
    %42 = arith.andi %22, %41 : vector<1x128xi32>
    %c0_i32_19 = arith.constant 0 : i32
    %43 = vector.broadcast %c0_i32_19 : i32 to vector<1x128xi32>
    %44 = arith.cmpi eq, %42, %43 : vector<1x128xi32>
    %45 = arith.select %44, %39, %40 : vector<1x128xi1>, vector<1x128xf32>
    %46 = arith.maximumf %38, %45 : vector<1x128xf32>
    %47 = arith.addf %46, %21 : vector<1x128xf32>
    %cst_20 = arith.constant 0xFF800000 : f32
    %48 = vector.broadcast %cst_20 : f32 to vector<1x128xf32>
    %49 = arith.select %5, %47, %48 : vector<1x128xi1>, vector<1x128xf32>
    %c0_21 = arith.constant 0 : index
    %c0_22 = arith.constant 0 : index
    %c0_23 = arith.constant 0 : index
    %50 = vector.load %arg6[%c0_21, %c0_22, %c0_23] : memref<1x1x128xf32, #tpu.memory_space<vmem>>, vector<1x1x128xf32>
    %51 = vector.shape_cast %50 : vector<1x1x128xf32> to vector<1x128xf32>
    %52 = vector.shape_cast %49 : vector<1x128xf32> to vector<1x1x128xf32>
    tpu.vector_store %arg6[%c0_21, %c0_22, %c0_23], %52 {strides = array<i32>} : memref<1x1x128xf32, #tpu.memory_space<vmem>>, vector<1x1x128xf32>,
    return
  }
  func.func @transform_0(%arg0: i32) -> (i32, i32, i32) {
    %c0_i32 = arith.constant 0 : i32
    %c0_i32_0 = arith.constant 0 : i32
    %c0_i32_1 = arith.constant 0 : i32
    return %arg0, %c0_i32, %c0_i32_0 : i32, i32, i32
  }
  func.func @transform_1(%arg0: i32) -> (i32, i32, i32) {
    %c0_i32 = arith.constant 0 : i32
    %c0_i32_0 = arith.constant 0 : i32
    %c0_i32_1 = arith.constant 0 : i32
    return %arg0, %c0_i32, %c0_i32_0 : i32, i32, i32
  }
  func.func @transform_2(%arg0: i32) -> (i32, i32) {
    %c0_i32 = arith.constant 0 : i32
    %c0_i32_0 = arith.constant 0 : i32
    %c0_i32_1 = arith.constant 0 : i32
    return %c0_i32, %c0_i32_0 : i32, i32
  }
  func.func @transform_3(%arg0: i32) -> (i32, i32) {
    %c0_i32 = arith.constant 0 : i32
    %c0_i32_0 = arith.constant 0 : i32
    %c0_i32_1 = arith.constant 0 : i32
    return %c0_i32, %c0_i32_0 : i32, i32
  }
  func.func @transform_4(%arg0: i32) -> (i32, i32) {
    %c0_i32 = arith.constant 0 : i32
    %c0_i32_0 = arith.constant 0 : i32
    %c0_i32_1 = arith.constant 0 : i32
    return %c0_i32, %c0_i32_0 : i32, i32
  }
  func.func @transform_5(%arg0: i32) -> (i32, i32, i32) {
    %c0_i32 = arith.constant 0 : i32
    %c0_i32_0 = arith.constant 0 : i32
    %c0_i32_1 = arith.constant 0 : i32
    return %arg0, %c0_i32, %c0_i32_0 : i32, i32, i32
  }
}

</mosaic_0001>

<bundles_post_ra>
// kernel: tpu_custom_call.1
= control target key start
LH: loop header
LB: loop body
LE: loop exit
PB: predicated region body
PF: predicated region fallthrough
CT: control target
= control target key end

     0   :  { %10 = vsyncpa [#allocation3], 0  ;;  %s1989_s0 = inlined_call_operand.vmem [shape: s32[2,1,128], index: 0, kind: input, shape index: {}]   ;;  %s1990_s1 = inlined_call_operand.vmem [shape: bf16[2,32,128], index: 1, kind: input, shape index: {}]   ;;  %s1991_s2 = inlined_call_operand.vmem [shape: bf16[320,32], index: 2, kind: input, shape index: {}]   ;;  %s1992_s3 = inlined_call_operand.vmem [shape: f32[8,320], index: 3, kind: input, shape index: {}]   ;;  %s1993_s4 = inlined_call_operand.vmem [shape: f32[328,1], index: 4, kind: input, shape index: {}]   ;;  %s1994_s5 = inlined_call_operand.hbm [shape: f32[2,1,128], index: 5, kind: output, shape index: {}]  }
   0x1   :  { %12 = vsyncpa [#allocation3 + $0x1], 0  ;;  %s1564_s18 = smov 0   ;;  %s1566_s19 = smov 0  }
   0x2   :  { %s1568_s20 = smov 0   ;;  %s1570_s21 = smov 0  }
   0x3 LB: > { %s1585_s22 = sadd.s32 4294967295, %s1521_s21   ;;  %s1206_s23 = sadd.s32 4294967294, %s1521_s21   ;;  %s1521_s21 = sphi %s1570_s21, %s2012_s21   ;;  %s1517_s20 = sphi %s1568_s20, %s2011_s20   ;;  %s1513_s19 = sphi %s1566_s19, %s2010_s19   ;;  %s1509_s18 = sphi %s1564_s18, %s2009_s18  }
   0x4   : > { %s1589_s24 = sadd.s32 1, %s1521_s21   ;;  %s140_s25 = sadd.s32 1, %s1517_s20 }
   0x5   : > { %s137_s26 = ssub.s32 %s1521_s21, %s1589_s24  ;;  %p150_p0 = scmp.ne.s32.totalorder %s1517_s20, %s1513_s19 }
   0x6   : > { %p138_p1 = scmp.eq.s32.totalorder %s137_s26, 0  ;;  %p151_p2 = scmp.eq.s32.totalorder %s1585_s22, 1 }
   0x7   : > { %p156_p3 = scmp.ne.s32.totalorder %s1513_s19, %s1509_s18  ;;  %p157_p4 = scmp.eq.s32.totalorder %s1206_s23, 1 }
   0x8   : > { %s1600_s27 = scalar_select %p138_p1, %s1517_s20, %s140_s25  }
   0x9   : > { %p1602_p5 = por %p151_p2, %p150_p0  ;;  %p1606_p6 = por %p157_p4, %p156_p3 }
   0xa   : > { %p1209_p7 = scmp.ge.s32.totalorder %s1521_s21, 1  ;;  %p198_p8 = scmp.lt.s32.totalorder %s1521_s21, 3 }
   0xc   : > { %p199_p9 = pnand %p1209_p7, %p198_p8 }
   0xe   : > { %202 = sbr.rel (%p199_p9) target bundleno = 905 (0x389), region = 40 }
  0x13   : > { %p228_p10 = scmp.lt.s32.totalorder %s1585_s22, 1  ;;  %v1441_v0 = vld [vmem:[%s1991_s2] sm:$0xff]   ;;  %vm636_vm0 = vcmask 261120   ;;  %v1523_v1 = vmov 0   ;;  %v273_v2 = vld [vmem:[%s1993_s4 + $0xf0] sm:$0xff]  ;;  %v274_v6 = vld [vmem:[%s1993_s4 + $0xf8] sm:$0xff] }
  0x14   : > { %1329 = vmatprep.mubr.msk.bf16.mxu0 %vm636_vm0, %v1441_v0  ;;  %1438 = vset.pattern.permute.xlu1 %v1523_v1  ;;  %v257_v3 = vld [vmem:[%s1993_s4 + $0x70] sm:$0xff]  ;;  %v256_v7 = vld [vmem:[%s1993_s4 + $0x68] sm:$0xff]  ;;  %v258_v8 = vld [vmem:[%s1993_s4 + $0x78] sm:$0xff]  ;;  %vm1525_vm1 = vmmov 0   ;;  %vm938_vm2 = vcmask 523264   ;;  %s1526_s30 = smov 1  }
  0x15   : > { %s1617_s7 = scalar_select %p228_p10, %s1585_s22, 1  ;;  %1437 = vset.pattern.permute.xlu0 %v1523_v1  ;;  %476 = vperm.xlu1 %1438, %v273_v2   ;;  %v1442_v9 = vld [vmem:[%s1991_s2 + $0x8] sm:$0xff]   ;;  %v1443_v10 = vld [vmem:[%s1991_s2 + $0x10] sm:$0xff]   ;;  %v255_v11 = vld [vmem:[%s1993_s4 + $0x60] sm:$0xff] }
  0x16   : > { %481 = vperm.xlu0 %1437, %v274_v6   ;;  %v272_v12 = vld [vmem:[%s1993_s4 + $0xe8] sm:$0xff]  ;;  %v254_v13 = vld [vmem:[%s1993_s4 + $0x58] sm:$0xff]  ;;  %v271_v14 = vld [vmem:[%s1993_s4 + $0xe0] sm:$0xff]  ;;  %s1527_s6 = smov 127   ;;  %s1530_s9 = smov 4  }
  0x17   : > { %s1258_s8 = sshll.u32 %s1617_s7, 4  ;;  %v1444_v15 = vld [vmem:[%s1991_s2 + $0x18] sm:$0xff]   ;;  %v1445_v16 = vld [vmem:[%s1991_s2 + $0x20] sm:$0xff]   ;;  %v253_v17 = vld [vmem:[%s1993_s4 + $0x50] sm:$0xff]  ;;  %s230_s26 = scalar_lea.vmem %s1989_s0, %s1617_s7 }
  0x18   : > { %s235_s13 = scalar_lea.vmem %s1990_s1, %s1258_s8  ;;  %v270_v18 = vld [vmem:[%s1993_s4 + $0xd8] sm:$0xff]  ;;  %v252_v19 = vld [vmem:[%s1993_s4 + $0x48] sm:$0xff]  ;;  %v269_v20 = vld [vmem:[%s1993_s4 + $0xd0] sm:$0xff]  ;;  %s1528_s7 = smov 2  }
  0x19   : > { %v1439_v4 = vld [vmem:[%s235_s13 + $0x8] sm:$0xff]   ;;  %v1440_v5 = vld [vmem:[%s235_s13] sm:$0xff]   ;;  %396 = vperm.xlu1 %1438, %v257_v3   ;;  %v1447_v22 = vld [vmem:[%s1991_s2 + $0x30] sm:$0xff]   ;;  %s1529_s8 = smov 126   ;;  %s1531_s10 = smov 124  }
  0x1a   : > { %1325 = vmatprep.subr.bf16.mxu0 %v1439_v4  ;;  %401 = vperm.xlu0 %1437, %v258_v8   ;;  %v1446_v21 = vld [vmem:[%s1991_s2 + $0x28] sm:$0xff]   ;;  %v251_v23 = vld [vmem:[%s1993_s4 + $0x40] sm:$0xff]  ;;  %v250_v25 = vld [vmem:[%s1993_s4 + $0x38] sm:$0xff]  ;;  %s226_s11 = sand.u32 1, %s1513_s19   ;;  %s1255_s12 = sshll.u32 %s1585_s22, 4 }
  0x1b   : > { %1326 = vmatpush3.bf16.msra.mxu0 %v1439_v4  ;;  %v268_v24 = vld [vmem:[%s1993_s4 + $0xc8] sm:$0xff]  ;;  %v267_v26 = vld [vmem:[%s1993_s4 + $0xc0] sm:$0xff]  ;;  %v1448_v27 = vld [vmem:[%s1991_s2 + $0x38] sm:$0xff]   ;;  %s227_s13 = scalar_lea.vmem [#allocation2], %s226_s11  ;;  %s1953_s17 = scalar_lea.hbm %s1994_s5, %s1255_s12 }
  0x1c   : > { %1327 = vmatprep.subr.bf16.mxu0 %v1440_v5  ;;  %v1449_v28 = vld [vmem:[%s1991_s2 + $0x40] sm:$0xff]   ;;  %v249_v29 = vld [vmem:[%s1993_s4 + $0x30] sm:$0xff]  ;;  %v266_v30 = vld [vmem:[%s1993_s4 + $0xb8] sm:$0xff]  ;;  %s1142_s14 = sshll.u32 %s227_s13, 4  ;;  %s1130_s23 = scalar_lea.sflag [#allocation3], %s226_s11  ;;  %s1143_s14 = int_to_ptr.vmem [resolvable:$true] %s1142_s14 }
  0x1d   : > { %391 = vperm.xlu1 %1438, %v256_v7   ;;  %v248_v31 = vld [vmem:[%s1993_s4 + $0x28] sm:$0xff]  ;;  %v265_v32 = vld [vmem:[%s1993_s4 + $0xb0] sm:$0xff]  ;;  %v247_v35 = vld [vmem:[%s1993_s4 + $0x20] sm:$0xff]  ;;  %s1461_s25 = scalar_lea.vmem %s1143_s14, 16 }
  0x1e   : > { %471 = vperm.xlu0 %1437, %v272_v12   ;;  %v1450_v33 = vld [vmem:[%s1991_s2 + $0x48] sm:$0xff]   ;;  %v1451_v34 = vld [vmem:[%s1991_s2 + $0x50] sm:$0xff]   ;;  %v246_v37 = vld [vmem:[%s1993_s4 + $0x18] sm:$0xff]  ;;  %p1462_p11 = scmp.ne.s32.totalorder %s1143_s14, %s1461_s25 }
  0x1f   : > { %1328 = vmatpush3.bf16.msra.mxu0 %v1440_v5  ;;  %v264_v36 = vld [vmem:[%s1993_s4 + $0xa8] sm:$0xff]  ;;  %v263_v38 = vld [vmem:[%s1993_s4 + $0xa0] sm:$0xff]  ;;  %v1452_v39 = vld [vmem:[%s1991_s2 + $0x58] sm:$0xff]  }
  0x20   : > { %v1453_v40 = vld [vmem:[%s1991_s2 + $0x60] sm:$0xff]   ;;  %v245_v41 = vld [vmem:[%s1993_s4 + $0x10] sm:$0xff]  ;;  %v262_v42 = vld [vmem:[%s1993_s4 + $0x98] sm:$0xff]  ;;  %p1463_p12 = pnand %p1462_p11, %p1602_p5 }
  0x21   : > { %386 = vperm.xlu1 %1438, %v255_v11   ;;  %v244_v43 = vld [vmem:[%s1993_s4 + $0x8] sm:$0xff]  ;;  %v261_v44 = vld [vmem:[%s1993_s4 + $0x90] sm:$0xff]  ;;  %v243_v47 = vld [vmem:[%s1993_s4] sm:$0xff] }
  0x22   : > { %1330 = vmatmul.mubr.msk.bf16.vlgmr.msra.gmra.mxu0 %vm636_vm0, %v1442_v9  ;;  %466 = vperm.xlu0 %1437, %v271_v14   ;;  %v1454_v45 = vld [vmem:[%s1991_s2 + $0x68] sm:$0xff]   ;;  %v1455_v46 = vld [vmem:[%s1991_s2 + $0x70] sm:$0xff]   ;;  %v259_v50 = vld [vmem:[%s1993_s4 + $0x80] sm:$0xff]  ;;  %p1464_p13 = pneg %p1463_p12 }
  0x23   : > { %1333 = vmatprep.mubr.msk.bf16.mxu0 %vm636_vm0, %v1443_v10  ;;  %v260_v48 = vld [vmem:[%s1993_s4 + $0x88] sm:$0xff]  ;;  %v281_v49 = vld [vmem:[%s1993_s4 + $0x130] sm:$0xff]  ;;  %v1456_v51 = vld [vmem:[%s1991_s2 + $0x78] sm:$0xff]  }
  0x24   : > { %v1457_v52 = vld [vmem:[%s1991_s2 + $0x80] sm:$0xff]   ;;  %v282_v54 = vld [vmem:[%s1993_s4 + $0x138] sm:$0xff]  ;;  %v277_v55 = vld [vmem:[%s1993_s4 + $0x110] sm:$0xff] }
  0x25   : > { %381 = vperm.xlu1 %1438, %v254_v13   ;;  %v279_v53 = vld [vmem:[%s1993_s4 + $0x120] sm:$0xff]  ;;  %v280_v56 = vld [vmem:[%s1993_s4 + $0x128] sm:$0xff]  ;;  %v1459_v58 = vld [vmem:[%s1991_s2 + $0x90] sm:$0xff]  }
  0x26   : > { %461 = vperm.xlu0 %1437, %v270_v18   ;;  %v1458_v57 = vld [vmem:[%s1991_s2 + $0x88] sm:$0xff]   ;;  %v275_v59 = vld [vmem:[%s1993_s4 + $0x100] sm:$0xff]  ;;  %v278_v60 = vld [vmem:[%s1993_s4 + $0x118] sm:$0xff] }
  0x27   : > { %v276_v61 = vld [vmem:[%s1993_s4 + $0x108] sm:$0xff]  ;;  %v1460_v62 = vld [vmem:[%s1991_s2 + $0x98] sm:$0xff]   ;;  %v283_v63 = vld [vmem:[%s1993_s4 + $0x140] sm:$0xff] }
  0x28   : > { %v931_v0 = vld [vmem:[%s1992_s3 + $0x8] sm:$0xff] }
  0x29   : > { %376 = vperm.xlu1 %1438, %v253_v17   ;;  %1006 = vmatprep.mubr.f32.mxu1 %v931_v0 }
  0x2a   : > { %1334 = vmatmul.mubr.msk.bf16.gmra.mxu0 %vm636_vm0, %v1444_v15  ;;  %456 = vperm.xlu0 %1437, %v269_v20  }
  0x2b   : > { %1337 = vmatprep.mubr.msk.bf16.mxu0 %vm636_vm0, %v1445_v16 }
  0x2d   : > { %371 = vperm.xlu1 %1438, %v252_v19  }
  0x2e   : > { %451 = vperm.xlu0 %1437, %v268_v24  }
  0x31   : > { %366 = vperm.xlu1 %1438, %v251_v23  }
  0x32   : > { %1338 = vmatmul.mubr.msk.bf16.gmra.mxu0 %vm636_vm0, %v1446_v21  ;;  %446 = vperm.xlu0 %1437, %v267_v26  }
  0x33   : > { %1341 = vmatprep.mubr.msk.bf16.mxu0 %vm636_vm0, %v1447_v22 }
  0x35   : > { %361 = vperm.xlu1 %1438, %v250_v25  }
  0x36   : > { %441 = vperm.xlu0 %1437, %v266_v30  }
  0x39   : > { %356 = vperm.xlu1 %1438, %v249_v29  }
  0x3a   : > { %1342 = vmatmul.mubr.msk.bf16.gmra.mxu0 %vm636_vm0, %v1448_v27  ;;  %436 = vperm.xlu0 %1437, %v265_v32  }
  0x3b   : > { %1345 = vmatprep.mubr.msk.bf16.mxu0 %vm636_vm0, %v1449_v28 }
  0x3d   : > { %351 = vperm.xlu1 %1438, %v248_v31  }
  0x3e   : > { %431 = vperm.xlu0 %1437, %v264_v36  }
  0x41   : > { %346 = vperm.xlu1 %1438, %v247_v35  }
  0x42   : > { %1346 = vmatmul.mubr.msk.bf16.gmra.mxu0 %vm636_vm0, %v1450_v33  ;;  %426 = vperm.xlu0 %1437, %v263_v38  }
  0x43   : > { %1349 = vmatprep.mubr.msk.bf16.mxu0 %vm636_vm0, %v1451_v34 }
  0x45   : > { %341 = vperm.xlu1 %1438, %v246_v37  }
  0x46   : > { %421 = vperm.xlu0 %1437, %v262_v42  }
  0x49   : > { %336 = vperm.xlu1 %1438, %v245_v41  }
  0x4a   : > { %1350 = vmatmul.mubr.msk.bf16.gmra.mxu0 %vm636_vm0, %v1452_v39  ;;  %416 = vperm.xlu0 %1437, %v261_v44  }
  0x4b   : > { %1353 = vmatprep.mubr.msk.bf16.mxu0 %vm636_vm0, %v1453_v40 }
  0x4d   : > { %331 = vperm.xlu1 %1438, %v244_v43  }
  0x4e   : > { %411 = vperm.xlu0 %1437, %v260_v48  }
  0x51   : > { %326 = vperm.xlu1 %1438, %v243_v47  }
  0x52   : > { %1354 = vmatmul.mubr.msk.bf16.gmra.mxu0 %vm636_vm0, %v1454_v45  ;;  %406 = vperm.xlu0 %1437, %v259_v50  }
  0x53   : > { %1357 = vmatprep.mubr.msk.bf16.mxu0 %vm636_vm0, %v1455_v46 }
  0x55   : > { %516 = vperm.xlu1 %1438, %v281_v49  }
  0x56   : > { %521 = vperm.xlu0 %1437, %v282_v54  }
  0x59   : > { %506 = vperm.xlu1 %1438, %v279_v53  }
  0x5a   : > { %1358 = vmatmul.mubr.msk.bf16.gmra.mxu0 %vm636_vm0, %v1456_v51  ;;  %511 = vperm.xlu0 %1437, %v280_v56  }
  0x5b   : > { %1361 = vmatprep.mubr.msk.bf16.mxu0 %vm636_vm0, %v1457_v52 }
  0x5d   : > { %496 = vperm.xlu1 %1438, %v277_v55  }
  0x5e   : > { %501 = vperm.xlu0 %1437, %v278_v60  }
  0x61   : > { %486 = vperm.xlu1 %1438, %v275_v59  }
  0x62   : > { %1362 = vmatmul.mubr.msk.bf16.gmra.mxu0 %vm636_vm0, %v1458_v57  ;;  %491 = vperm.xlu0 %1437, %v276_v61  }
  0x63   : > { %1365 = vmatprep.mubr.msk.bf16.mxu0 %vm636_vm0, %v1459_v58 }
  0x66   : > { %935 = vperm.xlu0 %1437, %v283_v63  }
  0x6a   : > { %1366 = vmatmul.mubr.msk.bf16.gmra.mxu0 %vm636_vm0, %v1460_v62 }
  0x90   : > { %v477_v2 = vpop.permute.xlu1 %476 }
  0x91   : > { %v482_v1 = vpop.permute.xlu0 %481 }
  0x94   : > { %v397_v4 = vpop.permute.xlu1 %396 }
  0x95   : > { %v402_v3 = vpop.permute.xlu0 %401 }
  0x98   : > { %v392_v9 = vpop.permute.xlu1 %391 }
  0x99   : > { %v472_v6 = vpop.permute.xlu0 %471 }
  0x9c   : > { %v387_v14 = vpop.permute.xlu1 %386 }
  0x9d   : > { %v467_v11 = vpop.permute.xlu0 %466 }
  0xa0   : > { %v382_v19 = vpop.permute.xlu1 %381 }
  0xa1   : > { %v462_v16 = vpop.permute.xlu0 %461 }
  0xa4   : > { %v377_v24 = vpop.permute.xlu1 %376 }
  0xa5   : > { %v457_v21 = vpop.permute.xlu0 %456 }
  0xa8   : > { %v1850_v29 = vpop.permute.xlu1 %371 }
  0xa9   : > { %v1848_v26 = vpop.permute.xlu0 %451 }
  0xac   : > { %v1858_v34 = vpop.permute.xlu1 %366 }
  0xad   : > { %v1852_v31 = vpop.permute.xlu0 %446 }
  0xb0   : > { %v1868_v39 = vpop.permute.xlu1 %361 }
  0xb1   : > { %v1862_v36 = vpop.permute.xlu0 %441 }
  0xb4   : > { %v1876_v44 = vpop.permute.xlu1 %356 }
  0xb5   : > { %v1872_v41 = vpop.permute.xlu0 %436 }
  0xb8   : > { %v1880_v49 = vpop.permute.xlu1 %351 }
  0xb9   : > { %v1878_v46 = vpop.permute.xlu0 %431 }
  0xbc   : > { %v1884_v54 = vpop.permute.xlu1 %346 }
  0xbd   : > { %v1882_v51 = vpop.permute.xlu0 %426 }
  0xc1   : > { %v1886_v57 = vpop.permute.xlu0 %421 }
  0xe2   : > { %v1826_v5 = vpop.f32.mrf.mxu0 }
  0xe3   : > { %1997 = vst [vmem:[#allocation5_spill] sm:$0xff] %v1826_v5 }
  0xe4   : > { %v1828_v7 = vpop.f32.mrf.mxu0 }
  0xe5   : > { %1998 = vst [vmem:[#allocation6_spill] sm:$0xff] %v1828_v7 }
  0xe6   : > { %v1830_v8 = vpop.f32.mrf.mxu0 }
  0xe8   : > { %v1832_v10 = vpop.f32.mrf.mxu0 }
  0xe9   : > { %1999 = vst [vmem:[#allocation7_spill] sm:$0xff] %v1832_v10 }
  0xea   : > { %v1834_v12 = vpop.f32.mrf.mxu0 }
  0xec   : > { %v1836_v13 = vpop.f32.mrf.mxu0 }
  0xee   : > { %v1838_v15 = vpop.f32.mrf.mxu0 }
  0xf0   : > { %v1840_v17 = vpop.f32.mrf.mxu0 }
  0xf2   : > { %v1842_v18 = vpop.f32.mrf.mxu0 }
  0xf4   : > { %v1844_v20 = vpop.f32.mrf.mxu0 }
  0xf6   : > { %v1340_v22 = vpop.f32.mrf.mxu0 }
  0xf8   : > { %v1846_v23 = vpop.f32.mrf.mxu0 }
  0xfa   : > { %v1343_v25 = vpop.f32.mrf.mxu0 }
  0xfb   : > { %v788_v60 = vadd.f32 %v1343_v25, %v397_v4  ;;  %v775_v4 = vadd.f32 %v1340_v22, %v382_v19 }
  0xfc   : > { %v779_v27 = vpop.f32.mrf.mxu0 }
  0xfe   : > { %v1344_v28 = vpop.f32.mrf.mxu0 }
  0xff   : > { %v791_v55 = vadd.f32 %v1344_v28, %v402_v3  ;;  %v780_v3 = vadd.f32 %v779_v27, %v387_v14  ;;  %v1892_v28 = vpop.permute.xlu0 %416 }
 0x100   : > { %v782_v30 = vpop.f32.mrf.mxu0 }
 0x101   : > { %v905_v0 = vmax.f32 %v791_v55, 0.0  ;;  %v783_v7 = vadd.f32 %v782_v30, %v392_v9 }
 0x102   : > { %v1854_v32 = vpop.f32.mrf.mxu0 }
 0x103   : > { %2000 = vst [vmem:[#allocation8_spill] sm:$0xff] %v1854_v32  ;;  %v904_v32 = vmax.f32 %v788_v60, 0.0 }
 0x104   : > { %v1856_v33 = vpop.f32.mrf.mxu0 }
 0x105   : > { %2001 = vst [vmem:[#allocation9_spill] sm:$0xff] %v1856_v33  ;;  %v1888_v33 = vpop.permute.xlu1 %341 }
 0x106   : > { %v1860_v35 = vpop.f32.mrf.mxu0 }
 0x108   : > { %v1864_v37 = vpop.f32.mrf.mxu0 }
 0x109   : > { %2002 = vst [vmem:[#allocation10_spill] sm:$0xff] %v1864_v37 }
 0x10a   : > { %v1866_v38 = vpop.f32.mrf.mxu0 }
 0x10c   : > { %v1870_v40 = vpop.f32.mrf.mxu0 }
 0x10e   : > { %v1352_v42 = vpop.f32.mrf.mxu0 }
 0x110   : > { %v1874_v43 = vpop.f32.mrf.mxu0 }
 0x112   : > { %v1355_v45 = vpop.f32.mrf.mxu0 }
 0x113   : > { %v836_v25 = vadd.f32 %v1355_v45, %v457_v21 }
 0x114   : > { %v827_v47 = vpop.f32.mrf.mxu0 }
 0x115   : > { %v916_v19 = vmax.f32 %v836_v25, 0.0  ;;  %v828_v21 = vadd.f32 %v827_v47, %v1852_v31  ;;  %v820_v31 = vadd.f32 %v1866_v38, %v1872_v41  ;;  %v812_v41 = vadd.f32 %v1870_v40, %v1882_v51  ;;  %v2003_v40 = vld [vmem:[#allocation8_spill] sm:$0xff] }
 0x116   : > { %v1356_v48 = vpop.f32.mrf.mxu0  ;;  %v804_v51 = vadd.f32 %v2003_v40, %v1892_v28 }
 0x117   : > { %v914_v45 = vmax.f32 %v828_v21, 0.0  ;;  %v912_v38 = vmax.f32 %v820_v31, 0.0 }
 0x118   : > { %v830_v50 = vpop.f32.mrf.mxu0 }
 0x119   : > { %v831_v27 = vadd.f32 %v830_v50, %v1848_v26  ;;  %v823_v26 = vadd.f32 %v1352_v42, %v1862_v36 }
 0x11a   : > { %v1359_v52 = vpop.f32.mrf.mxu0 }
 0x11b   : > { %v852_v58 = vadd.f32 %v1359_v52, %v477_v2  ;;  %v839_v2 = vadd.f32 %v1356_v48, %v462_v16  ;;  %v902_v52 = vmax.f32 %v780_v3, 0.0  ;;  %v901_v16 = vmax.f32 %v775_v4, 0.0  ;;  %v2007_v3 = vld [vmem:[#allocation9_spill] sm:$0xff]  ;;  %v2008_v4 = vld [vmem:[#allocation6_spill] sm:$0xff] }
 0x11c   : > { %v843_v53 = vpop.f32.mrf.mxu0  ;;  %v913_v42 = vmax.f32 %v823_v26, 0.0  ;;  %v751_v48 = vadd.f32 %v1840_v17, %v1880_v49  ;;  %v743_v17 = vadd.f32 %v1830_v8, %v1888_v33  ;;  %v2006_v8 = vld [vmem:[#allocation7_spill] sm:$0xff] }
 0x11d   : > { %v920_v10 = vmax.f32 %v852_v58, 0.0  ;;  %v844_v37 = vadd.f32 %v843_v53, %v467_v11  ;;  %v772_v11 = vadd.f32 %v1842_v18, %v377_v24  ;;  %v337_v53 = vpop.permute.xlu1 %336  ;;  %v917_v14 = vmax.f32 %v839_v2, 0.0 }
 0x11e   : > { %v1360_v56 = vpop.f32.mrf.mxu0  ;;  %v764_v24 = vadd.f32 %v1844_v20, %v1858_v34  ;;  %v756_v20 = vadd.f32 %v1834_v12, %v1876_v44  ;;  %v748_v44 = vadd.f32 %v1836_v13, %v1884_v54  ;;  %v895_v49 = vmax.f32 %v751_v48, 0.0  ;;  %v2004_v13 = vld [vmem:[#allocation5_spill] sm:$0xff]  ;;  %v932_v48 = vld [vmem:[%s1992_s3 + $0x10] sm:$0xff] }
 0x11f   : > { %v855_v59 = vadd.f32 %v1360_v56, %v482_v1  ;;  %v918_v9 = vmax.f32 %v844_v37, 0.0  ;;  %v900_v18 = vmax.f32 %v772_v11, 0.0  ;;  %v910_v58 = vmax.f32 %v812_v41, 0.0  ;;  %v241_v41 = vld [vmem:[%s230_s26] sm:$0x1]  ;;  %s1533_s26 = smov [#allocation2]  }
 0x120   : > { %v846_v61 = vpop.f32.mrf.mxu0  ;;  %v898_v34 = vmax.f32 %v764_v24, 0.0  ;;  %v896_v12 = vmax.f32 %v756_v20, 0.0  ;;  %v740_v54 = vadd.f32 %v2004_v13, %v337_v53  ;;  %v894_v60 = vmax.f32 %v748_v44, 0.0  ;;  %s1465_s22 = sshll.u32 %s1533_s26, 4  ;;  %s1466_s22 = int_to_ptr.vmem [resolvable:$false] %s1465_s22 }
 0x121   : > { %v847_v62 = vadd.f32 %v846_v61, %v472_v6  ;;  %v921_v63 = vmax.f32 %v855_v59, 0.0  ;;  %v903_v6 = vmax.f32 %v783_v7, 0.0  ;;  %v412_v7 = vpop.permute.xlu0 %411  ;;  %v332_v37 = vpop.permute.xlu1 %331  ;;  %v1524_v24 = vmov 0.0   ;;  %p1468_p0 = scmp.lt.s32.totalorder %s1143_s14, %s1466_s22 }
 0x122   : > { %v1890_v5 = vpop.f32.mrf.mxu0  ;;  %v735_v33 = vadd.f32 %v2006_v8, %v332_v37  ;;  %vm242_vm3 = vcmp.lt.s32.totalorder %v241_v41, 16 }
 0x123   : > { %1281 = vmatprep.subr.mxu1 %v921_v63  ;;  %v919_v1 = vmax.f32 %v847_v62, 0.0  ;;  %v893_v63 = vmax.f32 %v743_v17, 0.0  ;;  %v1083_v17 = vlaneseq }
 0x124   : > { %1282 = vmatpush3.msra.mxu1 %v905_v0  ;;  %v1894_v30 = vpop.f32.mrf.mxu0  ;;  %v908_v0 = vmax.f32 %v804_v51, 0.0  ;;  %v891_v11 = vmax.f32 %v735_v33, 0.0 }
 0x125   : > { %1283 = vmatprep.subr.mxu1 %v920_v10  ;;  %v767_v10 = vadd.f32 %v1846_v23, %v1850_v29  ;;  %v759_v23 = vadd.f32 %v1838_v15, %v1868_v39  ;;  %v407_v36 = vpop.permute.xlu0 %406  ;;  %v815_v15 = vadd.f32 %v1874_v43, %v1878_v46  ;;  %v327_v55 = vpop.permute.xlu1 %326  ;;  %v807_v43 = vadd.f32 %v1860_v35, %v1886_v57  ;;  %v2005_v57 = vld [vmem:[#allocation10_spill] sm:$0xff] }
 0x126   : > { %1284 = vmatpush3.msra.mxu1 %v904_v32  ;;  %v1901_v22 = vpop.f32.mrf.mxu0  ;;  %v915_v32 = vmax.f32 %v831_v27, 0.0  ;;  %v799_v62 = vadd.f32 %v2005_v57, %v412_v7  ;;  %v796_v2 = vadd.f32 %v2007_v3, %v407_v36  ;;  %v930_v7 = vld [vmem:[%s1992_s3] sm:$0xff]  ;;  %v1532_v57 = vmov 1966171168  }
 0x127   : > { %1285 = vmatprep.subr.mxu1 %v919_v1  ;;  %v899_v29 = vmax.f32 %v767_v10, 0.0  ;;  %v897_v39 = vmax.f32 %v759_v23, 0.0  ;;  %v911_v46 = vmax.f32 %v815_v15, 0.0  ;;  %v909_v35 = vmax.f32 %v807_v43, 0.0 }
 0x128   : > { %1286 = vmatpush3.msra.mxu1 %v903_v6  ;;  %v1910_v47 = vpop.f32.mrf.mxu0  ;;  %v892_v1 = vmax.f32 %v740_v54, 0.0  ;;  %v732_v6 = vadd.f32 %v2008_v4, %v327_v55  ;;  %v1114_v8 = vshrl.u32 %v1083_v17, 7 }
 0x129   : > { %1287 = vmatprep.subr.mxu1 %v918_v9  ;;  %v522_v56 = vpop.permute.xlu0 %521  ;;  %v517_v61 = vpop.permute.xlu1 %516  ;;  %v907_v9 = vmax.f32 %v799_v62, 0.0  ;;  %v1111_v62 = vunpack.c.l.s4 %v1532_v57 }
 0x12a   : > { %1288 = vmatpush3.msra.mxu1 %v902_v52  ;;  %v1367_v50 = vpop.f32.mrf.mxu0 }
 0x12b   : > { %1289 = vmatprep.subr.mxu1 %v917_v14  ;;  %v906_v14 = vmax.f32 %v796_v2, 0.0  ;;  %v884_v10 = vadd.f32 %v1367_v50, %v517_v61 }
 0x12c   : > { %1290 = vmatpush3.msra.mxu1 %v901_v16  ;;  %v875_v59 = vpop.f32.mrf.mxu0  ;;  %v890_v16 = vmax.f32 %v732_v6, 0.0 }
 0x12d   : > { %1291 = vmatprep.subr.mxu1 %v916_v19  ;;  %v512_v25 = vpop.permute.xlu0 %511  ;;  %v507_v53 = vpop.permute.xlu1 %506  ;;  %v928_v26 = vmax.f32 %v884_v10, 0.0 }
 0x12e   : > { %1292 = vmatpush3.msra.mxu1 %v900_v18  ;;  %v1368_v28 = vpop.f32.mrf.mxu0 }
 0x12f   : > { %1293 = vmatprep.subr.mxu1 %v915_v32  ;;  %v887_v52 = vadd.f32 %v1368_v28, %v522_v56  ;;  %v876_v32 = vadd.f32 %v875_v59, %v507_v53 }
 0x130   : > { %1294 = vmatpush3.msra.mxu1 %v899_v29  ;;  %v878_v27 = vpop.f32.mrf.mxu0 }
 0x131   : > { %1295 = vmatprep.subr.mxu1 %v914_v45  ;;  %v929_v19 = vmax.f32 %v887_v52, 0.0  ;;  %v879_v21 = vadd.f32 %v878_v27, %v512_v25  ;;  %v502_v18 = vpop.permute.xlu0 %501  ;;  %v497_v23 = vpop.permute.xlu1 %496  ;;  %v926_v45 = vmax.f32 %v876_v32, 0.0 }
 0x132   : > { %1296 = vmatpush3.msra.mxu1 %v898_v34  ;;  %v871_v29 = vadd.f32 %v1901_v22, %v502_v18  ;;  %v868_v31 = vadd.f32 %v1890_v5, %v497_v23 }
 0x133   : > { %1297 = vmatprep.subr.mxu1 %v913_v42  ;;  %v927_v37 = vmax.f32 %v879_v21, 0.0 }
 0x134   : > { %1298 = vmatpush3.msra.mxu1 %v897_v39  ;;  %v925_v34 = vmax.f32 %v871_v29, 0.0  ;;  %v924_v15 = vmax.f32 %v868_v31, 0.0 }
 0x135   : > { %1299 = vmatprep.subr.mxu1 %v912_v38  ;;  %v492_v20 = vpop.permute.xlu0 %491  ;;  %v487_v42 = vpop.permute.xlu1 %486 }
 0x136   : > { %1300 = vmatpush3.msra.mxu1 %v896_v12  ;;  %v863_v36 = vadd.f32 %v1910_v47, %v492_v20  ;;  %v860_v39 = vadd.f32 %v1894_v30, %v487_v42 }
 0x137   : > { %1301 = vmatprep.subr.mxu1 %v911_v46 }
 0x138   : > { %1302 = vmatpush3.msra.mxu1 %v895_v49  ;;  %v923_v22 = vmax.f32 %v863_v36, 0.0  ;;  %v922_v5 = vmax.f32 %v860_v39, 0.0  ;;  %v1084_v49 = vand.u32 127, %v1083_v17 }
 0x139   : > { %1303 = vmatprep.subr.mxu1 %v910_v58  ;;  %v936_v50 = vpop.permute.xlu0 %935 }
 0x13a   : > { %1304 = vmatpush3.msra.mxu1 %v894_v60  ;;  %v1089_v56 = vand.u32 1, %v1084_v49  ;;  %v1097_v13 = vand.u32 2, %v1084_v49  ;;  %v1105_v3 = vand.u32 4, %v1084_v49 }
 0x13b   : > { %1305 = vmatprep.subr.mxu1 %v909_v35 }
 0x13c   : > { %1306 = vmatpush3.msra.mxu1 %v893_v63  ;;  %vm1090_vm4 = vcmp.eq.s32.totalorder %v1089_v56, 0  ;;  %vm1098_vm5 = vcmp.eq.s32.totalorder %v1097_v13, 0  ;;  %v1112_v63 = vunpack.c.0.s8 %v1111_v62  ;;  %vm1106_vm6 = vcmp.eq.s32.totalorder %v1105_v3, 0 }
 0x13d   : > { %1307 = vmatprep.subr.mxu1 %v908_v0 }
 0x13e   : > { %1308 = vmatpush3.msra.mxu1 %v892_v1  ;;  %v1115_v33 = vsub.s32 %v1112_v63, %v1114_v8 }
 0x13f   : > { %1309 = vmatprep.subr.mxu1 %v907_v9 }
 0x140   : > { %1310 = vmatpush3.msra.mxu1 %v891_v11 }
 0x141   : > { %1311 = vmatprep.subr.mxu1 %v906_v14 }
 0x142   : > { %1312 = vmatpush3.msra.mxu1 %v890_v16 }
 0x143   : > { %1007 = vmatmul.mubr.f32.vlgmr.msra.gmra.mxu1 %v930_v7  ;;  %1369 = vmatprep.subr.mxu1 %v1524_v24 }
 0x144   : > { %1370 = vmatpush3.msra.mxu1 %v929_v19  ;;  %1385 = vmatprep.mubr.msk.f32.mxu1 %vm1525_vm1, %v1524_v24 }
 0x145   : > { %1371 = vmatprep.subr.mxu1 %v1524_v24 }
 0x146   : > { %1372 = vmatpush3.msra.mxu1 %v928_v26 }
 0x147   : > { %1373 = vmatprep.subr.mxu1 %v1524_v24 }
 0x148   : > { %1374 = vmatpush3.msra.mxu1 %v927_v37 }
 0x149   : > { %1375 = vmatprep.subr.mxu1 %v1524_v24 }
 0x14a   : > { %1376 = vmatpush3.msra.mxu1 %v926_v45 }
 0x14b   : > { %1377 = vmatprep.subr.mxu1 %v1524_v24 }
 0x14c   : > { %1378 = vmatpush3.msra.mxu1 %v925_v34 }
 0x14d   : > { %1379 = vmatprep.subr.mxu1 %v1524_v24 }
 0x14e   : > { %1380 = vmatpush3.msra.mxu1 %v924_v15 }
 0x14f   : > { %1381 = vmatprep.subr.mxu1 %v1524_v24 }
 0x150   : > { %1382 = vmatpush3.msra.mxu1 %v923_v22 }
 0x151   : > { %1383 = vmatprep.subr.mxu1 %v1524_v24 }
 0x152   : > { %1384 = vmatpush3.msra.mxu1 %v922_v5 }
 0x153   : > { %1386 = vmatmul.mubr.msk.f32.vlgmr.msra.gmra.mxu1 %vm938_vm2, %v932_v48 }
 0x203   : > { %v1313_v47 = vpop.f32.mrf.mxu1 }
 0x205   : > { %v1314_v38 = vpop.f32.mrf.mxu1 }
 0x206   : > { %v1315_v30 = vadd.f32 %v1314_v38, %v1313_v47 }
 0x208   : > { %v1009_v12 = vadd.f32 %v1315_v30, %v936_v50 }
 0x213   : > { %v1078_v44 = vpop.f32.mrf.mxu1 }
 0x214   : > { %v1079_v55 = vadd.f32 %v1078_v44, %v1009_v12 }
 0x215   : > { %v1387_v43 = vpop.f32.mrf.mxu1 }
 0x216   : > { %v1082_v46 = vsel %vm242_vm3, %v1079_v55, -inf  ;;  %v1116_v0 = vrot.slane %v1079_v55, %v1115_v33 }
 0x217   : > { %1087 = vrot.lane.b32.xlu0 %v1082_v46, %s1526_s30  ;;  %1085 = vrot.lane.b32.xlu1 %v1082_v46, %s1527_s6  ;;  %s1467_s30 = scalar_lea.vmem %s1466_s22, 32 }
 0x218   : > { %v1117_v2 = vcombine.high %v1116_v0, %v1116_v0  ;;  %p1469_p1 = scmp.lt.s32.totalorder %s1467_s30, %s1461_s25 }
 0x21a   : > { %v1124_v6 = vrot.slane %v1117_v2, %v1115_v33  ;;  %p1470_p2 = por %p1469_p1, %p1468_p0 }
 0x21c   : > { %p1471_p3 = pnand %p1470_p2, %p1464_p13 }
 0x289   : > { %v1088_v40 = vpop.permute.xlu0 %1087  ;;  %v1086_v51 = vpop.permute.xlu1 %1085 }
 0x28a   : > { %v1091_v58 = vsel %vm1090_vm4, %v1086_v51, %v1088_v40 }
 0x28b   : > { %v1092_v59 = vmax.f32 %v1082_v46, %v1091_v58 }
 0x28d   : > { %1095 = vrot.lane.b32.xlu0 %v1092_v59, %s1528_s7  ;;  %1093 = vrot.lane.b32.xlu1 %v1092_v59, %s1529_s8 }
 0x2ff   : > { %v1096_v54 = vpop.permute.xlu0 %1095  ;;  %v1094_v60 = vpop.permute.xlu1 %1093 }
 0x300   : > { %v1099_v61 = vsel %vm1098_vm5, %v1094_v60, %v1096_v54 }
 0x301   : > { %v1100_v35 = vmax.f32 %v1092_v59, %v1099_v61 }
 0x303   : > { %1103 = vrot.lane.b32.xlu0 %v1100_v35, %s1530_s9  ;;  %1101 = vrot.lane.b32.xlu1 %v1100_v35, %s1531_s10 }
 0x375   : > { %v1104_v28 = vpop.permute.xlu0 %1103  ;;  %v1102_v1 = vpop.permute.xlu1 %1101 }
 0x376   : > { %v1107_v4 = vsel %vm1106_vm6, %v1102_v1, %v1104_v28 }
 0x377   : > { %v1108_v25 = vmax.f32 %v1100_v35, %v1107_v4 }
 0x379   : > { %v1126_v9 = vadd.f32 %v1124_v6, %v1108_v25 }
 0x37b   : > { %v1127_v11 = vsel %vm242_vm3, %v1126_v9, -inf }
 0x37c   : > { %1128 = vst [vmem:[%s227_s13] sm:$0x1] %v1127_v11 }
 0x37d   : > { %1474 = shalt.err (!%p1471_p3)
}
 0x37e   : > { %s1475_s6 = scalar_lea.hbm %s1953_s17, 16  ;;  %s1479_s9 = scalar_lea.hbm %s1994_s5, 32 }
 0x37f   : > { %p1476_p4 = scmp.ne.s32.totalorder %s1953_s17, %s1475_s6  ;;  %p1480_p9 = scmp.lt.s32.totalorder %s1953_s17, %s1994_s5 }
 0x380   : > { %p1481_p10 = scmp.lt.s32.totalorder %s1479_s9, %s1475_s6 }
 0x381   : > { %p1477_p7 = pnand %p1476_p4, %p1602_p5 }
 0x382   : > { %p1482_p11 = por %p1481_p10, %p1480_p9 }
 0x383   : > { %p1478_p8 = pneg %p1477_p7 }
 0x385   : > { %p1483_p12 = pnand %p1482_p11, %p1478_p8 }
 0x387   : > { %1486 = shalt.err (!%p1483_p12)
}
 0x388   : > { %1388 = dma.vmem_to_hbm [thread:$0]  (%p1602_p5), %s1143_s14, 16, %s1953_s17, %s1130_s23  }
 0x389 PF: > { %p1394_p13 = scmp.ge.s32.totalorder %s1521_s21, 2  ;;  %s1154_s12 = sand.u32 1, %s1509_s18  }
 0x38a   : > { %s1155_s13 = scalar_lea.sflag [#allocation3], %s1154_s12 }
 0x38b   : > { %p1391_p0 = pnand %p1394_p13, %p1606_p6 }
 0x38d   : > { %p1392_p1 = pneg %p1391_p0 }
 0x38f   : > { %1504 = dma.done.wait (%p1392_p1), %s1155_s13, 16  }
 0x390   : > { %1506 = vsyncadd (%p1392_p1), %s1155_s13, 4294967280  ;;  %p15_p2 = scmp.ge.s32.totalorder %s1589_s24, 4   ;;  %s2009_s18 = smov %s1513_s19 }
 0x391   : > { %s2010_s19 = smov %s1517_s20  ;;  %s2011_s20 = smov %s1600_s27 }
 0x392   : > { %s2012_s21 = smov %s1589_s24  ;;  %17 = sbr.rel (!%p15_p2) target bundleno = 3 (0x3), region = 78 }
 0x397   :  { %1159 = vsyncpa [#allocation3], 1 }
 0x398   :  { %1161 = vsyncpa [#allocation3 + $0x1], 1 }

</bundles_post_ra>
